<compile_context>
chip_gen: v6e
topology: v6e:2x2x1
jax: 0.10.0
libtpu: 0.0.40
codegen_flags: <defaults>
</compile_context>

<pallas_src>
import jax
import jax.numpy as jnp
from jax.experimental import pallas as pl
from jax.experimental.pallas import tpu as pltpu


# ----------------------------------------------------------------------------
# Pallas kernel: one SimCLRSender forward per grid step (agent axis).
#   h    = x @ W1^T                     (Linear bias cancels under batch-BN)
#   hbn  = BatchNorm1d(h)               (training mode: batch mean / biased var)
#   proj = ReLU(hbn)                    ("first_projection")
#   out  = proj @ W2^T                  (fc_out, bias=False)
# ----------------------------------------------------------------------------
def _simclr_agent_kernel(x_ref, w1_ref, bn_ref, w2_ref, out_ref, proj_ref):
    x = x_ref[...]                                    # (B, Din)  bf16
    w1 = w1_ref[...]                                  # (Hp, Din) bf16

    # fc: Linear(input_dim -> hidden_dim); x @ w1^T via contracting dims.
    h = jax.lax.dot_general(
        x, w1,
        dimension_numbers=(((1,), (1,)), ((), ())),
        preferred_element_type=jnp.float32)           # (B, Hp) f32

    # BatchNorm1d (training statistics, eps=1e-5), single pass, folded to
    # a single scale/shift over the (B, Hp) tile.
    inv_b = 1.0 / h.shape[0]
    mean = jnp.sum(h, axis=0, keepdims=True) * inv_b            # (1, Hp)
    ex2 = jnp.sum(h * h, axis=0, keepdims=True) * inv_b         # (1, Hp)
    var = jnp.maximum(ex2 - mean * mean, 0.0)                   # biased var
    gamma = bn_ref[0:1, :]                                      # (1, Hp)
    beta = bn_ref[1:2, :]                                       # (1, Hp)
    scale = gamma * jax.lax.rsqrt(var + 1e-5)                   # (1, Hp)
    shift = beta - mean * scale                                 # (1, Hp)

    # ReLU(BN(h)) -> first_projection; store as bf16 (detached aux output).
    proj = jnp.maximum(h * scale + shift, 0.0)                  # (B, Hp) f32
    proj_bf16 = proj.astype(jnp.bfloat16)
    proj_ref[...] = proj_bf16

    # fc_out: Linear(hidden_dim -> output_dim, bias=False); proj @ w2^T.
    out_ref[...] = jax.lax.dot_general(
        proj_bf16, w2_ref[...],
        dimension_numbers=(((1,), (1,)), ((), ())),
        preferred_element_type=jnp.float32).astype(out_ref.dtype)


# ----------------------------------------------------------------------------
# One-time parameter preparation (pad, stack agents, cast) — hoisted out of
# the per-forward path.
# ----------------------------------------------------------------------------
def _round_up(n, m):
    return -(-n // m) * m


def _pad_to(a, shape):
    pads = [(0, t - s) for s, t in zip(a.shape, shape)]
    if all(p == (0, 0) for p in pads):
        return a
    return jnp.pad(a, pads)


def prepare_agent_pair_params(sender_params, receiver_params):
    """Pads/stacks/casts both agents' weights once into kernel-ready form."""
    hidden, d_in = sender_params["w1"].shape
    d_out = sender_params["w2"].shape[0]
    # TODO(synk): fusion assumes sender/receiver share (d_in, hidden, d_out),
    # which holds for PerAgentGame population setups.
    assert receiver_params["w1"].shape == (hidden, d_in)
    assert receiver_params["w2"].shape == (d_out, hidden)

    hp = _round_up(hidden, 128)          # lane-padded hidden dim
    op = _round_up(d_out, 128)           # lane-padded output dim

    def stack(name, tgt_shape, dtype):
        a = _pad_to(sender_params[name], tgt_shape).astype(dtype)
        b = _pad_to(receiver_params[name], tgt_shape).astype(dtype)
        return jnp.stack([a, b], axis=0)

    # Note: b1 is intentionally NOT used — a Linear bias followed by
    # training-mode BatchNorm cancels exactly.
    w1 = stack("w1", (hp, d_in), jnp.bfloat16)                  # (2, Hp, Din)
    w2 = stack("w2", (op, hp), jnp.bfloat16)                    # (2, Op, Hp)
    gamma = stack("gamma", (hp,), jnp.float32)                  # (2, Hp)
    beta = stack("beta", (hp,), jnp.float32)                    # (2, Hp)
    bn = jnp.stack([gamma, beta], axis=1)                       # (2, 2, Hp)

    return dict(w1=w1, w2=w2, bn=bn,
                d_in=d_in, hidden=hidden, d_out=d_out, hp=hp, op=op)


# ----------------------------------------------------------------------------
# Fused sender + receiver SimCLRSender forward (one pallas_call, grid=(2,)).
# ----------------------------------------------------------------------------
def dual_simclr_forward(prepared, x_sender, x_receiver):
    """Runs both agents' SimCLRSender.forward in a single Pallas call.

    Returns (out, first_projection, resnet_output) per agent, matching the
    PyTorch module in training mode (discrete_evaluation branch not taken).
    """
    B, d_in = x_sender.shape
    assert d_in == prepared["d_in"]
    assert x_receiver.shape == (B, d_in)
    hp, op = prepared["hp"], prepared["op"]
    hidden, d_out = prepared["hidden"], prepared["d_out"]

    # Only the activations are cast per call; weights are already prepared.
    x_p = jnp.stack([x_sender, x_receiver], axis=0).astype(jnp.bfloat16)

    # VMEM budget: double-buffered inputs/outputs + f32 intermediates + slack.
    bytes_in = B * d_in * 2 + hp * d_in * 2 + 2 * hp * 4 + op * hp * 2
    bytes_out = B * op * 4 + B * hp * 2
    vmem_bytes = max(2 * (bytes_in + bytes_out) + 3 * B * hp * 4 + (4 << 20),
                     16 << 20)

    agent = lambda *dims: pl.BlockSpec((pl.Squeezed(),) + dims,
                                       lambda a: (a,) + (0,) * len(dims))

    out_p, proj_p = pl.pallas_call(
        _simclr_agent_kernel,
        grid=(2,),
        out_shape=(
            jax.ShapeDtypeStruct((2, B, op), jnp.float32),     # out
            jax.ShapeDtypeStruct((2, B, hp), jnp.bfloat16),    # first_projection
        ),
        in_specs=[
            agent(B, d_in),      # x        (no K padding — full-dim block)
            agent(hp, d_in),     # w1
            agent(2, hp),        # [gamma; beta]
            agent(op, hp),       # w2
        ],
        out_specs=(
            agent(B, op),
            agent(B, hp),
        ),
        compiler_params=pltpu.CompilerParams(
            dimension_semantics=("parallel",),   # 2 agents -> 2 TCs on v7x
            vmem_limit_bytes=int(vmem_bytes)),
    )(x_p, prepared["w1"], prepared["bn"], prepared["w2"])

    # Skip the slice entirely when the dims were already 128-aligned.
    out = out_p if op == d_out else out_p[:, :, :d_out]
    proj = proj_p if hp == hidden else proj_p[:, :, :hidden]

    sender_res = (out[0], jax.lax.stop_gradient(proj[0]),
                  jax.lax.stop_gradient(x_sender))
    receiver_res = (out[1], jax.lax.stop_gradient(proj[1]),
                    jax.lax.stop_gradient(x_receiver))
    return sender_res, receiver_res


# ----------------------------------------------------------------------------
# PerAgentGame.forward (SimCLRSender branch), training mode.
# ----------------------------------------------------------------------------
def per_agent_game_forward(prepared_params, loss_fn, sender_input_pair,
                           labels):
    sender_input, receiver_input = sender_input_pair

    # isinstance(sender, SimCLRSender) branch: sender(sender_input, sender=True)
    # and receiver(receiver_input), fused into one Pallas launch.
    (message, _message_like, _resnet_s), (receiver_output, _, _resnet_r) = (
        dual_simclr_forward(prepared_params, sender_input, receiver_input))

    # TODO(synk): `loss` is a runtime callable in the original module; a
    # deterministic per-sample loss is supplied by the caller here.
    loss, aux_info = loss_fn(sender_input, message, receiver_input,
                             receiver_output, labels, None)

    # Training mode: SimCLRSender has no `temperature`, and the eval-only aux
    # entries (message_like, resnet outputs) are not added.
    # TODO(synk): LoggingStrategy.filtered_interaction has no Pallas/JAX
    # equivalent; a plain dict stands in for the Interaction record.
    interaction = dict(
        sender_input=sender_input,
        receiver_input=receiver_input,
        labels=labels,
        aux_input=None,
        receiver_output=jax.lax.stop_gradient(receiver_output),
        message=jax.lax.stop_gradient(message),
        message_length=jnp.ones((message.shape[0],), jnp.float32),
        aux=aux_info,
    )
    return jnp.mean(loss), interaction


# ----------------------------------------------------------------------------
# Deterministic parameter init (PyTorch-default-like shapes/values).
# ----------------------------------------------------------------------------
def init_simclr_params(key, input_dim, hidden_dim, output_dim):
    k1, k2, k3 = jax.random.split(key, 3)
    lim1 = 1.0 / jnp.sqrt(input_dim)
    lim2 = 1.0 / jnp.sqrt(hidden_dim)
    return dict(
        # b1 is kept in the param set for fidelity with nn.Linear, but it is
        # unused: a Linear bias followed by training-mode BatchNorm cancels.
        w1=jax.random.uniform(k1, (hidden_dim, input_dim), jnp.float32,
                              -lim1, lim1),
        b1=jax.random.uniform(k2, (hidden_dim,), jnp.float32, -lim1, lim1),
        gamma=jnp.ones((hidden_dim,), jnp.float32),
        beta=jnp.zeros((hidden_dim,), jnp.float32),
        w2=jax.random.uniform(k3, (output_dim, hidden_dim), jnp.float32,
                              -lim2, lim2),
    )


def example_loss(sender_input, message, receiver_input, receiver_output,
                 labels, aux_input):
    # Simple deterministic per-sample loss (stand-in for the game's loss fn).
    per_sample = jnp.mean((message - receiver_output) ** 2, axis=-1)
    return per_sample, {"acc": jnp.zeros_like(per_sample)}


if __name__ == "__main__":
    B, D_IN, HIDDEN, D_OUT = 8, 32, 64, 64

    key = jax.random.PRNGKey(0)
    k_sx, k_rx, k_sp, k_rp, k_lab = jax.random.split(key, 5)

    sender_input = jax.random.normal(k_sx, (B, D_IN), jnp.float32)
    receiver_input = jax.random.normal(k_rx, (B, D_IN), jnp.float32)
    labels = jax.random.randint(k_lab, (B,), 0, D_OUT)

    sender_params = init_simclr_params(k_sp, D_IN, HIDDEN, D_OUT)
    receiver_params = init_simclr_params(k_rp, D_IN, HIDDEN, D_OUT)

    # One-time weight prep (pad + stack + cast), reused for every forward.
    prepared = prepare_agent_pair_params(sender_params, receiver_params)

    loss_mean, interaction = per_agent_game_forward(
        prepared, example_loss, (sender_input, receiver_input), labels)

    jax.block_until_ready(loss_mean)
    jax.block_until_ready(interaction["message"])
    jax.block_until_ready(interaction["receiver_output"])

    assert interaction["message"].shape == (B, D_OUT)
    assert interaction["receiver_output"].shape == (B, D_OUT)
    assert interaction["message_length"].shape == (B,)
    assert bool(jnp.isfinite(loss_mean))
    print("KERNEL_OK")
</pallas_src>

<mosaic_0001>
module attributes {stable_mosaic.version = 11 : i64} {
  func.func @_simclr_agent_kernel(%arg0: i32, %arg1: memref<1x8x32xbf16, #tpu.memory_space<vmem>>, %arg2: memref<1x128x32xbf16, #tpu.memory_space<vmem>>, %arg3: memref<1x2x128xf32, #tpu.memory_space<vmem>>, %arg4: memref<1x128x128xbf16, #tpu.memory_space<vmem>>, %arg5: memref<1x8x128xf32, #tpu.memory_space<vmem>>, %arg6: memref<1x8x128xbf16, #tpu.memory_space<vmem>>) attributes {dimension_semantics = [#tpu.dimension_semantics<parallel>], iteration_bounds = array<i64: 2>, scalar_prefetch = 0 : i64, scratch_operands = 0 : i64, tpu.core_type = #tpu.core_type<tc>, window_params = [{transform_indices = @transform_0, window_bounds = array<i64: 1, 8, 32>}, {transform_indices = @transform_1, window_bounds = array<i64: 1, 128, 32>}, {transform_indices = @transform_2, window_bounds = array<i64: 1, 2, 128>}, {transform_indices = @transform_3, window_bounds = array<i64: 1, 128, 128>}, {transform_indices = @transform_4, window_bounds = array<i64: 1, 8, 128>}, {transform_indices = @transform_5, window_bounds = array<i64: 1, 8, 128>}]} {
    %c0 = arith.constant 0 : index
    %c0_0 = arith.constant 0 : index
    %c0_1 = arith.constant 0 : index
    %0 = vector.load %arg1[%c0, %c0_0, %c0_1] : memref<1x8x32xbf16, #tpu.memory_space<vmem>>, vector<1x8x32xbf16>
    %1 = vector.shape_cast %0 : vector<1x8x32xbf16> to vector<8x32xbf16>
    %c0_2 = arith.constant 0 : index
    %c0_3 = arith.constant 0 : index
    %c0_4 = arith.constant 0 : index
    %2 = vector.load %arg2[%c0_2, %c0_3, %c0_4] : memref<1x128x32xbf16, #tpu.memory_space<vmem>>, vector<1x128x32xbf16>
    %3 = vector.shape_cast %2 : vector<1x128x32xbf16> to vector<128x32xbf16>
    %cst = arith.constant dense<0.000000e+00> : vector<8x128xf32>
    %4 = tpu.matmul %1, %3, %cst {dimension_numbers = #tpu.dot_dimension_numbers<[1], [1], [0], [0], [0, 0, 1, 0], [], []>} : vector<8x32xbf16>, vector<128x32xbf16>, vector<8x128xf32> -> vector<8x128xf32>
    %cst_5 = arith.constant dense<0.000000e+00> : vector<128xf32>
    %5 = vector.multi_reduction <add>, %4, %cst_5 [0] : vector<8x128xf32> to vector<128xf32>
    %6 = vector.shape_cast %5 : vector<128xf32> to vector<1x128xf32>
    %cst_6 = arith.constant 1.250000e-01 : f32
    %7 = vector.broadcast %cst_6 : f32 to vector<1x128xf32>
    %8 = arith.mulf %6, %7 : vector<1x128xf32>
    %9 = arith.mulf %4, %4 : vector<8x128xf32>
    %cst_7 = arith.constant dense<0.000000e+00> : vector<128xf32>
    %10 = vector.multi_reduction <add>, %9, %cst_7 [0] : vector<8x128xf32> to vector<128xf32>
    %11 = vector.shape_cast %10 : vector<128xf32> to vector<1x128xf32>
    %cst_8 = arith.constant 1.250000e-01 : f32
    %12 = vector.broadcast %cst_8 : f32 to vector<1x128xf32>
    %13 = arith.mulf %11, %12 : vector<1x128xf32>
    %14 = arith.mulf %8, %8 : vector<1x128xf32>
    %15 = arith.subf %13, %14 : vector<1x128xf32>
    %cst_9 = arith.constant 0.000000e+00 : f32
    %16 = vector.broadcast %cst_9 : f32 to vector<1x128xf32>
    %17 = arith.maximumf %15, %16 : vector<1x128xf32>
    %c0_10 = arith.constant 0 : index
    %c0_11 = arith.constant 0 : index
    %c0_12 = arith.constant 0 : index
    %18 = vector.load %arg3[%c0_10, %c0_11, %c0_12] : memref<1x2x128xf32, #tpu.memory_space<vmem>>, vector<1x1x128xf32>
    %19 = vector.shape_cast %18 : vector<1x1x128xf32> to vector<1x128xf32>
    %c0_13 = arith.constant 0 : index
    %c1 = arith.constant 1 : index
    %c0_14 = arith.constant 0 : index
    %20 = vector.load %arg3[%c0_13, %c1, %c0_14] : memref<1x2x128xf32, #tpu.memory_space<vmem>>, vector<1x1x128xf32>
    %21 = vector.shape_cast %20 : vector<1x1x128xf32> to vector<1x128xf32>
    %cst_15 = arith.constant 9.99999974E-6 : f32
    %22 = vector.broadcast %cst_15 : f32 to vector<1x128xf32>
    %23 = arith.addf %17, %22 : vector<1x128xf32>
    %24 = math.rsqrt %23 : vector<1x128xf32>
    %25 = arith.mulf %19, %24 : vector<1x128xf32>
    %26 = arith.mulf %8, %25 : vector<1x128xf32>
    %27 = arith.subf %21, %26 : vector<1x128xf32>
    %28 = vector.broadcast %25 : vector<1x128xf32> to vector<8x128xf32>
    %29 = arith.mulf %4, %28 : vector<8x128xf32>
    %30 = vector.broadcast %27 : vector<1x128xf32> to vector<8x128xf32>
    %31 = arith.addf %29, %30 : vector<8x128xf32>
    %cst_16 = arith.constant 0.000000e+00 : f32
    %32 = vector.broadcast %cst_16 : f32 to vector<8x128xf32>
    %33 = arith.maximumf %31, %32 : vector<8x128xf32>
    %34 = arith.truncf %33 : vector<8x128xf32> to vector<8x128xbf16>
    %c0_17 = arith.constant 0 : index
    %c0_18 = arith.constant 0 : index
    %c0_19 = arith.constant 0 : index
    %35 = vector.load %arg6[%c0_17, %c0_18, %c0_19] : memref<1x8x128xbf16, #tpu.memory_space<vmem>>, vector<1x8x128xbf16>
    %36 = vector.shape_cast %35 : vector<1x8x128xbf16> to vector<8x128xbf16>
    %37 = vector.shape_cast %34 : vector<8x128xbf16> to vector<1x8x128xbf16>
    tpu.vector_store %arg6[%c0_17, %c0_18, %c0_19], %37 {strides = array<i32>} : memref<1x8x128xbf16, #tpu.memory_space<vmem>>, vector<1x8x128xbf16>,
    %c0_20 = arith.constant 0 : index
    %c0_21 = arith.constant 0 : index
    %c0_22 = arith.constant 0 : index
    %38 = vector.load %arg4[%c0_20, %c0_21, %c0_22] : memref<1x128x128xbf16, #tpu.memory_space<vmem>>, vector<1x128x128xbf16>
    %39 = vector.shape_cast %38 : vector<1x128x128xbf16> to vector<128x128xbf16>
    %cst_23 = arith.constant dense<0.000000e+00> : vector<8x128xf32>
    %40 = tpu.matmul %34, %39, %cst_23 {dimension_numbers = #tpu.dot_dimension_numbers<[1], [1], [0], [0], [0, 0, 1, 0], [], []>} : vector<8x128xbf16>, vector<128x128xbf16>, vector<8x128xf32> -> vector<8x128xf32>
    %c0_24 = arith.constant 0 : index
    %c0_25 = arith.constant 0 : index
    %c0_26 = arith.constant 0 : index
    %41 = vector.load %arg5[%c0_24, %c0_25, %c0_26] : memref<1x8x128xf32, #tpu.memory_space<vmem>>, vector<1x8x128xf32>
    %42 = vector.shape_cast %41 : vector<1x8x128xf32> to vector<8x128xf32>
    %43 = vector.shape_cast %40 : vector<8x128xf32> to vector<1x8x128xf32>
    tpu.vector_store %arg5[%c0_24, %c0_25, %c0_26], %43 {strides = array<i32>} : memref<1x8x128xf32, #tpu.memory_space<vmem>>, vector<1x8x128xf32>,
    return
  }
  func.func @transform_0(%arg0: i32) -> (i32, i32, i32) {
    %c0_i32 = arith.constant 0 : i32
    %c0_i32_0 = arith.constant 0 : i32
    %c0_i32_1 = arith.constant 0 : i32
    return %arg0, %c0_i32, %c0_i32_0 : i32, i32, i32
  }
  func.func @transform_1(%arg0: i32) -> (i32, i32, i32) {
    %c0_i32 = arith.constant 0 : i32
    %c0_i32_0 = arith.constant 0 : i32
    %c0_i32_1 = arith.constant 0 : i32
    return %arg0, %c0_i32, %c0_i32_0 : i32, i32, i32
  }
  func.func @transform_2(%arg0: i32) -> (i32, i32, i32) {
    %c0_i32 = arith.constant 0 : i32
    %c0_i32_0 = arith.constant 0 : i32
    %c0_i32_1 = arith.constant 0 : i32
    return %arg0, %c0_i32, %c0_i32_0 : i32, i32, i32
  }
  func.func @transform_3(%arg0: i32) -> (i32, i32, i32) {
    %c0_i32 = arith.constant 0 : i32
    %c0_i32_0 = arith.constant 0 : i32
    %c0_i32_1 = arith.constant 0 : i32
    return %arg0, %c0_i32, %c0_i32_0 : i32, i32, i32
  }
  func.func @transform_4(%arg0: i32) -> (i32, i32, i32) {
    %c0_i32 = arith.constant 0 : i32
    %c0_i32_0 = arith.constant 0 : i32
    %c0_i32_1 = arith.constant 0 : i32
    return %arg0, %c0_i32, %c0_i32_0 : i32, i32, i32
  }
  func.func @transform_5(%arg0: i32) -> (i32, i32, i32) {
    %c0_i32 = arith.constant 0 : i32
    %c0_i32_0 = arith.constant 0 : i32
    %c0_i32_1 = arith.constant 0 : i32
    return %arg0, %c0_i32, %c0_i32_0 : i32, i32, i32
  }
}

</mosaic_0001>

<bundles_post_ra>
// kernel: tpu_custom_call.1
= control target key start
LH: loop header
LB: loop body
LE: loop exit
PB: predicated region body
PF: predicated region fallthrough
CT: control target
= control target key end

     0   :  { %11 = vsyncpa [#allocation3], 0  ;;  %s1183_s0 = inlined_call_operand.vmem [shape: bf16[2,8,32], index: 0, kind: input, shape index: {}]   ;;  %s1184_s1 = inlined_call_operand.vmem [shape: bf16[2,128,32], index: 1, kind: input, shape index: {}]   ;;  %s1185_s2 = inlined_call_operand.vmem [shape: f32[2,2,128], index: 2, kind: input, shape index: {}]   ;;  %s1186_s3 = inlined_call_operand.vmem [shape: bf16[2,128,128], index: 3, kind: input, shape index: {}]   ;;  %s1187_s4 = inlined_call_operand.hbm [shape: f32[2,8,128], index: 4, kind: output, shape index: {0}]   ;;  %s1188_s5 = inlined_call_operand.hbm [shape: bf16[2,8,128], index: 5, kind: output, shape index: {1}]  }
   0x1   :  { %13 = vsyncpa [#allocation3 + $0x1], 0 }
   0x2   :  { %14 = vsyncpa [#allocation5], 0 }
   0x3   :  { %16 = vsyncpa [#allocation5 + $0x1], 0  ;;  %s1001_s18 = smov 0   ;;  %s1003_s19 = smov 0  }
   0x4   :  { %s1005_s20 = smov 0   ;;  %s1007_s21 = smov 0  }
   0x5 LB: > { %s1022_s22 = sadd.s32 4294967295, %s965_s21   ;;  %s716_s23 = sadd.s32 4294967294, %s965_s21   ;;  %s965_s21 = sphi %s1007_s21, %s1194_s21   ;;  %s961_s20 = sphi %s1005_s20, %s1193_s20   ;;  %s957_s19 = sphi %s1003_s19, %s1192_s19   ;;  %s953_s18 = sphi %s1001_s18, %s1191_s18  }
   0x6   : > { %s1026_s24 = sadd.s32 1, %s965_s21   ;;  %s133_s25 = sadd.s32 1, %s961_s20 }
   0x7   : > { %s130_s26 = ssub.s32 %s965_s21, %s1026_s24  ;;  %p143_p0 = scmp.ne.s32.totalorder %s961_s20, %s957_s19 }
   0x8   : > { %p131_p1 = scmp.eq.s32.totalorder %s130_s26, 0  ;;  %p144_p2 = scmp.eq.s32.totalorder %s1022_s22, 1 }
   0x9   : > { %p149_p3 = scmp.ne.s32.totalorder %s957_s19, %s953_s18  ;;  %p150_p4 = scmp.eq.s32.totalorder %s716_s23, 1 }
   0xa   : > { %s1037_s27 = scalar_select %p131_p1, %s961_s20, %s133_s25  }
   0xb   : > { %p1039_p5 = por %p144_p2, %p143_p0  ;;  %p1043_p6 = por %p150_p4, %p149_p3 }
   0xc   : > { %p719_p7 = scmp.ge.s32.totalorder %s965_s21, 1  ;;  %p224_p8 = scmp.lt.s32.totalorder %s965_s21, 3 }
   0xe   : > { %p225_p9 = pnand %p719_p7, %p224_p8 }
   0xf   : > { %p270_p10 = scmp.lt.s32.totalorder (!%p225_p9), %s1022_s22, 1  ;;  %s748_s8 = sshll.u32 (!%p225_p9), %s1022_s22, 6 }
  0x10   : > { %228 = sbr.rel (%p225_p9) target bundleno = 542 (0x21e), region = 36  ;;  %s587_s11 = scalar_lea.hbm (!%p225_p9), %s1188_s5, %s748_s8 }
  0x11   : > { %s969_s15 = smov (!%p225_p9), [#allocation4]  }
  0x15   : > { %v967_v0 = vmov 0.0   ;;  %vm968_vm0 = vmmov 0   ;;  %s1053_s30 = scalar_select %p270_p10, %s1022_s22, 1  ;;  %vm346_vm1 = vcmask 261120   ;;  %v439_v49 = vlaneseq }
  0x16   : > { %771 = vmatprep.subr.bf16.mxu0 %v967_v0  ;;  %787 = vmatprep.mubr.msk.bf16.mxu0 %vm968_vm0, %v967_v0 }
  0x17   : > { %791 = vmatprep.subr.bf16.mxu1 %v967_v0  ;;  %807 = vmatprep.mubr.msk.bf16.mxu1 %vm968_vm0, %v967_v0  ;;  %s751_s6 = sshll.u32 %s1053_s30, 6  ;;  %s722_s13 = sshll.u32 %s1053_s30, 2  ;;  %v440_v50 = vshrl.u32 %v439_v49, 7 }
  0x18   : > { %s1061_s9 = scalar_lea.vmem %s1184_s1, %s751_s6  ;;  %s1070_s12 = scalar_lea.vmem %s1186_s3, %s751_s6 }
  0x19   : > { %v857_v1 = vld [vmem:[%s1061_s9 + $0x38] sm:$0xff]   ;;  %v858_v3 = vld [vmem:[%s1061_s9 + $0x30] sm:$0xff]   ;;  %v859_v6 = vld [vmem:[%s1061_s9 + $0x28] sm:$0xff]   ;;  %s273_s16 = scalar_lea.vmem %s1183_s0, %s722_s13  ;;  %s725_s17 = sshll.u32 %s1053_s30, 1  ;;  %v441_v52 = vsub.s32 0, %v440_v50 }
  0x1a   : > { %v372_v2 = vsel %vm346_vm1, %v857_v1, 0  ;;  %v369_v4 = vsel %vm346_vm1, %v858_v3, 0  ;;  %v865_v5 = vld [vmem:[%s1070_s12 + $0x38] sm:$0xff]   ;;  %v866_v7 = vld [vmem:[%s1070_s12 + $0x30] sm:$0xff]   ;;  %v366_v8 = vsel %vm346_vm1, %v859_v6, 0  ;;  %v860_v9 = vld [vmem:[%s1061_s9 + $0x20] sm:$0xff]   ;;  %s282_s26 = scalar_lea.vmem %s1185_s2, %s725_s17 }
  0x1b   : > { %772 = vmatpush3.bf16.xpose.msra.mxu0 %v372_v2  ;;  %792 = vmatpush3.bf16.xpose.msra.mxu1 %v865_v5  ;;  %v363_v10 = vsel %vm346_vm1, %v860_v9, 0  ;;  %v861_v11 = vld [vmem:[%s1061_s9 + $0x18] sm:$0xff]   ;;  %v862_v13 = vld [vmem:[%s1061_s9 + $0x10] sm:$0xff]   ;;  %v863_v15 = vld [vmem:[%s1061_s9 + $0x8] sm:$0xff]   ;;  %s1116_s6 = sand.u32 1, %s957_s19  }
  0x1c   : > { %773 = vmatprep.subr.bf16.mxu0 %v967_v0  ;;  %793 = vmatprep.subr.bf16.mxu1 %v967_v0  ;;  %v360_v12 = vsel %vm346_vm1, %v861_v11, 0  ;;  %v357_v14 = vsel %vm346_vm1, %v862_v13, 0  ;;  %v354_v16 = vsel %vm346_vm1, %v863_v15, 0  ;;  %v864_v17 = vld [vmem:[%s1061_s9] sm:$0xff]   ;;  %v867_v20 = vld [vmem:[%s1070_s12 + $0x28] sm:$0xff]   ;;  %v869_v22 = vld [vmem:[%s1070_s12 + $0x18] sm:$0xff]  }
  0x1d   : > { %v351_v18 = vsel %vm346_vm1, %v864_v17, 0  ;;  %v289_v19 = vld [vmem:[%s273_s16] sm:$0xf]  ;;  %v870_v23 = vld [vmem:[%s1070_s12 + $0x10] sm:$0xff]   ;;  %v871_v24 = vld [vmem:[%s1070_s12 + $0x8] sm:$0xff]   ;;  %s721_s30 = sshll.u32 %s1116_s6, 2 }
  0x1e   : > { %v868_v21 = vld [vmem:[%s1070_s12 + $0x20] sm:$0xff]   ;;  %s269_s7 = scalar_lea.vmem [#allocation4], %s721_s30  ;;  %s563_s13 = scalar_lea.sflag [#allocation5], %s1116_s6 }
  0x1f   : > { %v872_v25 = vld [vmem:[%s1070_s12] sm:$0xff]   ;;  %s589_s12 = sshll.u32 %s269_s7, 4  ;;  %s879_s16 = sshll.u32 %s969_s15, 4  ;;  %s590_s12 = int_to_ptr.vmem [resolvable:$true] %s589_s12  ;;  %s880_s16 = int_to_ptr.vmem [resolvable:$false] %s879_s16 }
  0x20   : > { %v432_v51 = vld [vmem:[%s282_s26] sm:$0x1]  ;;  %v433_v55 = vld [vmem:[%s282_s26 + $0x1] sm:$0x1]  ;;  %s875_s14 = scalar_lea.vmem %s590_s12, 64  ;;  %s881_s17 = scalar_lea.vmem %s880_s16, 128 }
  0x21   : > { %p876_p11 = scmp.ne.s32.totalorder %s590_s12, %s875_s14  ;;  %p882_p0 = scmp.lt.s32.totalorder %s590_s12, %s880_s16 }
  0x22   : > { %p883_p1 = scmp.lt.s32.totalorder %s881_s17, %s875_s14 }
  0x23   : > { %774 = vmatpush3.bf16.xpose.msra.mxu0 %v369_v4  ;;  %794 = vmatpush3.bf16.xpose.msra.mxu1 %v866_v7  ;;  %p877_p12 = pnand %p876_p11, %p1039_p5 }
  0x24   : > { %775 = vmatprep.subr.bf16.mxu0 %v967_v0  ;;  %795 = vmatprep.subr.bf16.mxu1 %v967_v0  ;;  %p884_p2 = por %p883_p1, %p882_p0 }
  0x25   : > { %p878_p13 = pneg %p877_p12 }
  0x27   : > { %p885_p3 = pnand %p884_p2, %p878_p13 }
  0x2b   : > { %776 = vmatpush3.bf16.xpose.msra.mxu0 %v366_v8  ;;  %796 = vmatpush3.bf16.xpose.msra.mxu1 %v867_v20 }
  0x2c   : > { %777 = vmatprep.subr.bf16.mxu0 %v967_v0  ;;  %797 = vmatprep.subr.bf16.mxu1 %v967_v0 }
  0x33   : > { %778 = vmatpush3.bf16.xpose.msra.mxu0 %v363_v10  ;;  %798 = vmatpush3.bf16.xpose.msra.mxu1 %v868_v21 }
  0x34   : > { %779 = vmatprep.subr.bf16.mxu0 %v967_v0  ;;  %799 = vmatprep.subr.bf16.mxu1 %v967_v0 }
  0x3b   : > { %780 = vmatpush3.bf16.xpose.msra.mxu0 %v360_v12  ;;  %800 = vmatpush3.bf16.xpose.msra.mxu1 %v869_v22 }
  0x3c   : > { %781 = vmatprep.subr.bf16.mxu0 %v967_v0  ;;  %801 = vmatprep.subr.bf16.mxu1 %v967_v0 }
  0x43   : > { %782 = vmatpush3.bf16.xpose.msra.mxu0 %v357_v14  ;;  %802 = vmatpush3.bf16.xpose.msra.mxu1 %v870_v23 }
  0x44   : > { %783 = vmatprep.subr.bf16.mxu0 %v967_v0  ;;  %803 = vmatprep.subr.bf16.mxu1 %v967_v0 }
  0x4b   : > { %784 = vmatpush3.bf16.xpose.msra.mxu0 %v354_v16  ;;  %804 = vmatpush3.bf16.xpose.msra.mxu1 %v871_v24 }
  0x4c   : > { %785 = vmatprep.subr.bf16.mxu0 %v967_v0  ;;  %805 = vmatprep.subr.bf16.mxu1 %v967_v0 }
  0x53   : > { %786 = vmatpush3.bf16.xpose.msra.mxu0 %v351_v18  ;;  %806 = vmatpush3.bf16.xpose.msra.mxu1 %v872_v25 }
  0x5a   : > { %788 = vmatmul.mubr.msk.bf16.vlgmr.msra.gmra.mxu0 %vm346_vm1, %v289_v19 }
 0x11a   : > { %v408_v26 = vpop.f32.mrf.mxu0 }
 0x11b   : > { %v414_v27 = vrot.slane %v408_v26, 4  ;;  %v421_v28 = vmul.f32 %v408_v26, %v408_v26 }
 0x11c   : > { %v789_v29 = vpop.f32.mrf.mxu0 }
 0x11d   : > { %v415_v30 = vadd.f32 %v414_v27, %v408_v26  ;;  %v422_v31 = vrot.slane %v421_v28, 4 }
 0x11e   : > { %v411_v32 = vpop.f32.mrf.mxu0 }
 0x11f   : > { %v416_v33 = vrot.slane %v415_v30, 2  ;;  %v423_v34 = vadd.f32 %v422_v31, %v421_v28 }
 0x120   : > { %v790_v35 = vpop.f32.mrf.mxu0 }
 0x121   : > { %v417_v36 = vadd.f32 %v416_v33, %v415_v30  ;;  %v424_v37 = vrot.slane %v423_v34, 2 }
 0x123   : > { %v418_v38 = vrot.slane %v417_v36, 1  ;;  %v425_v39 = vadd.f32 %v424_v37, %v423_v34 }
 0x125   : > { %v419_v40 = vadd.f32 %v418_v38, %v417_v36  ;;  %v426_v41 = vrot.slane %v425_v39, 1 }
 0x127   : > { %v420_v42 = vmul.f32 0.125, %v419_v40  ;;  %v427_v43 = vadd.f32 %v426_v41, %v425_v39 }
 0x129   : > { %v428_v44 = vmul.f32 0.125, %v427_v43  ;;  %v429_v45 = vmul.f32 %v420_v42, %v420_v42 }
 0x12b   : > { %v430_v46 = vsub.f32 %v428_v44, %v429_v45 }
 0x12d   : > { %v431_v47 = vmax.f32 %v430_v46, 0.0 }
 0x12f   : > { %v434_v48 = vadd.f32 1e-05, %v431_v47 }
 0x131   : > { %873 = vrsqrt.f32 %v434_v48 }
 0x13e   : > { %v874_v53 = vpop.eup %873 }
 0x13f   : > { %v436_v54 = vmul.f32 %v874_v53, %v432_v51 }
 0x141   : > { %v442_v56 = vrot.slane %v436_v54, %v441_v52  ;;  %v437_v57 = vmul.f32 %v436_v54, %v420_v42 }
 0x143   : > { %v438_v58 = vsub.f32 %v433_v55, %v437_v57  ;;  %v443_v59 = vmul.f32 %v442_v56, %v408_v26 }
 0x145   : > { %v447_v60 = vrot.slane %v438_v58, %v441_v52 }
 0x147   : > { %v448_v61 = vadd.f32 %v447_v60, %v443_v59 }
 0x149   : > { %v449_v62 = vmax.f32 %v448_v61, 0.0 }
 0x14b   : > { %v450_v63 = vpack.c.bf16 %v449_v62, %v449_v62 }
 0x14d   : > { %808 = vmatmul.mubr.bf16.vlgmr.msra.gmra.mxu1 %v450_v63  ;;  %451 = vst [vmem:[%s269_s7] sm:$0xf] %v450_v63 }
 0x14e   : > { %888 = shalt.err (!%p885_p3)
}
 0x14f   : > { %s889_s23 = scalar_lea.hbm %s587_s11, 64  ;;  %s893_s30 = scalar_lea.hbm %s1188_s5, 128 }
 0x150   : > { %p890_p4 = scmp.ne.s32.totalorder %s587_s11, %s889_s23  ;;  %p894_p9 = scmp.lt.s32.totalorder %s587_s11, %s1188_s5 }
 0x151   : > { %p895_p10 = scmp.lt.s32.totalorder %s893_s30, %s889_s23 }
 0x152   : > { %p891_p7 = pnand %p890_p4, %p1039_p5 }
 0x153   : > { %p896_p11 = por %p895_p10, %p894_p9 }
 0x154   : > { %p892_p8 = pneg %p891_p7 }
 0x156   : > { %p897_p12 = pnand %p896_p11, %p892_p8 }
 0x158   : > { %900 = shalt.err (!%p897_p12)
}
 0x159   : > { %812 = dma.vmem_to_hbm [thread:$0]  (%p1039_p5), %s590_s12, 64, %s587_s11, %s563_s13  }
 0x15a   : > { %s720_s9 = sshll.u32 %s1116_s6, 3  ;;  %s747_s15 = sshll.u32 %s1022_s22, 7 }
 0x15b   : > { %s262_s10 = scalar_lea.vmem [#allocation2], %s720_s9  ;;  %s1143_s23 = scalar_lea.hbm %s1187_s4, %s747_s15 }
 0x15c   : > { %s576_s14 = sshll.u32 %s262_s10, 4  ;;  %s558_s25 = scalar_lea.sflag [#allocation3], %s1116_s6  ;;  %s1138_s14 = int_to_ptr.vmem [resolvable:$true] %s576_s14 }
 0x15d   : > { %s901_s26 = scalar_lea.vmem %s1138_s14, 128  ;;  %s970_s22 = smov [#allocation2]  }
 0x15e   : > { %p902_p13 = scmp.ne.s32.totalorder %s1138_s14, %s901_s26  ;;  %s905_s11 = sshll.u32 %s970_s22, 4  ;;  %s906_s11 = int_to_ptr.vmem [resolvable:$false] %s905_s11 }
 0x15f   : > { %s907_s12 = scalar_lea.vmem %s906_s11, 256  ;;  %p908_p2 = scmp.lt.s32.totalorder %s1138_s14, %s906_s11 }
 0x160   : > { %p903_p0 = pnand %p902_p13, %p1039_p5  ;;  %p909_p3 = scmp.lt.s32.totalorder %s907_s12, %s901_s26 }
 0x162   : > { %p904_p1 = pneg %p903_p0  ;;  %p910_p4 = por %p909_p3, %p908_p2 }
 0x164   : > { %p911_p7 = pnand %p910_p4, %p904_p1 }
 0x20d   : > { %v550_v0 = vpop.f32.mrf.mxu1 }
 0x20e   : > { %556 = vst [vmem:[%s262_s10] sm:$0xff] %v550_v0 }
 0x20f   : > { %v809_v1 = vpop.f32.mrf.mxu1 }
 0x210   : > { %914 = shalt.err (!%p911_p7)
}
 0x211   : > { %s915_s13 = scalar_lea.hbm %s1143_s23, 128  ;;  %s919_s7 = scalar_lea.hbm %s1187_s4, 256 }
 0x212   : > { %p916_p8 = scmp.ne.s32.totalorder %s1143_s23, %s915_s13  ;;  %p920_p11 = scmp.lt.s32.totalorder %s1143_s23, %s1187_s4 }
 0x213   : > { %p921_p12 = scmp.lt.s32.totalorder %s919_s7, %s915_s13 }
 0x214   : > { %p917_p9 = pnand %p916_p8, %p1039_p5 }
 0x215   : > { %p922_p13 = por %p921_p12, %p920_p11 }
 0x216   : > { %p918_p10 = pneg %p917_p9 }
 0x218   : > { %p923_p0 = pnand %p922_p13, %p918_p10 }
 0x21a   : > { %926 = shalt.err (!%p923_p0)
}
 0x21b   : > { %811 = dma.vmem_to_hbm [thread:$0]  (%p1039_p5), %s1138_s14, 128, %s1143_s23, %s558_s25   ;;  %v553_v2 = vpop.f32.mrf.mxu1 }
 0x21d   : > { %v810_v3 = vpop.f32.mrf.mxu1 }
 0x21e PF: > { %p822_p1 = scmp.ge.s32.totalorder %s965_s21, 2  ;;  %s601_s10 = sand.u32 1, %s953_s18  }
 0x21f   : > { %s602_s15 = scalar_lea.sflag [#allocation3], %s601_s10 }
 0x220   : > { %p816_p2 = pnand %p822_p1, %p1043_p6 }
 0x222   : > { %p817_p3 = pneg %p816_p2 }
 0x224   : > { %944 = dma.done.wait (%p817_p3), %s602_s15, 128  }
 0x225   : > { %946 = vsyncadd (%p817_p3), %s602_s15, 4294967168  ;;  %s611_s16 = scalar_lea.sflag [#allocation5], %s601_s10 }
 0x226   : > { %948 = dma.done.wait (%p817_p3), %s611_s16, 64  }
 0x227   : > { %950 = vsyncadd (%p817_p3), %s611_s16, 4294967232  ;;  %p19_p5 = scmp.ge.s32.totalorder %s1026_s24, 4   ;;  %s1191_s18 = smov %s957_s19 }
 0x228   : > { %s1192_s19 = smov %s961_s20  ;;  %s1193_s20 = smov %s1037_s27 }
 0x229   : > { %s1194_s21 = smov %s1026_s24  ;;  %21 = sbr.rel (!%p19_p5) target bundleno = 5 (0x5), region = 97 }
 0x22e   :  { %616 = vsyncpa [#allocation3], 1 }
 0x22f   :  { %618 = vsyncpa [#allocation3 + $0x1], 1 }
 0x230   :  { %619 = vsyncpa [#allocation5], 1 }
 0x231   :  { %621 = vsyncpa [#allocation5 + $0x1], 1 }

</bundles_post_ra>
